<compile_context>
chip_gen: v6e
topology: v6e:2x2x1
jax: 0.10.0
libtpu: 0.0.40
codegen_flags: <defaults>
</compile_context>

<pallas_src>
import functools

import numpy as np
import jax
import jax.numpy as jnp
from jax import lax
from jax.experimental import pallas as pl
from jax.experimental.pallas import tpu as pltpu


def _sim_kernel(d_ref, a_ref, f_ref, *rest, normalize, inv_tau, eps, use_gram):
    """One (data-tile, dictionary) grid point. Writes a (1, TM) output block."""
    if normalize:
        fn2_ref, o_ref = rest            # hoisted feature-norm^2 tile + output
    else:
        (o_ref,) = rest

    D = d_ref[0]                         # (F, K)   this dictionary (compute dtype)
    A = a_ref[0]                         # (K, TM)  this dictionary's coefficients
    feat = f_ref[...]                    # (F, TM)  shared feature tile
    Af = A.astype(jnp.float32)

    if use_gram:
        # K <= F: contract over F on the MXU; never materialize (F, TM).
        # G = D^T @ feat  -> (K, TM)
        G = lax.dot_general(D, feat, (((0,), (0,)), ((), ())),
                            preferred_element_type=jnp.float32)
        sim = jnp.sum(Af * G, axis=0, keepdims=True)              # (1, TM)
        if normalize:
            gram = lax.dot_general(D, D, (((0,), (0,)), ((), ())),
                                   preferred_element_type=jnp.float32)  # (K, K)
            GA = jnp.dot(gram, Af, preferred_element_type=jnp.float32)  # (K, TM)
            fr_n2 = jnp.sum(Af * GA, axis=0, keepdims=True)       # ||D@A||^2 per col
    else:
        # F < K: classic f_r = D @ alpha form.
        f_r = jnp.dot(D, A, preferred_element_type=jnp.float32)   # (F, TM)
        featf = feat.astype(jnp.float32)
        sim = jnp.sum(f_r * featf, axis=0, keepdims=True)
        if normalize:
            fr_n2 = jnp.sum(f_r * f_r, axis=0, keepdims=True)

    if normalize:
        # sim / max(||f_r||*||feat||, eps) == sim * rsqrt(max(prod^2, eps^2))
        denom2 = jnp.maximum(fr_n2 * fn2_ref[...], eps * eps)
        sim = sim * lax.rsqrt(denom2)

    res = jnp.exp(sim * inv_tau)                                   # (1, TM)
    o_ref[...] = res[None]                                         # (1, 1, TM)


def _choose_tm(F, K, M, in_bytes, vmem_budget=24 * 1024 * 1024):
    """Pick an M tile: multiple of 128, sized for the smallest-VMEM chip (v7x)."""
    m_pad128 = pl.cdiv(M, 128) * 128
    tm = min(512, m_pad128)

    def tile_bytes(t):
        io = 2 * (F + K + 1) * t * in_bytes          # double-buffered streamed inputs
        out = 2 * t * 4                              # double-buffered output block
        interm = (min(F, K) + 8) * t * 4             # G / f_r + small row vectors
        fixed = 2 * F * K * in_bytes + K * K * 4     # dictionary block + Gram
        return io + out + interm + fixed

    while tm > 128 and tile_bytes(tm) > vmem_budget:
        tm //= 2
    return tm


def compute_dict_sim(dicts, alphas, feature, *, normalize=False, tau=1.0,
                     eps=1e-8, compute_dtype=jnp.bfloat16, tm=None):
    """Returns dict_sim[N_dict, M] = exp(similarity / tau)."""
    N, F, K = dicts.shape
    _, K2, M = alphas.shape
    assert K == K2 and feature.shape == (F, M)

    # Note: for toy F/K/M a plain XLA einsum would beat per-grid-step overhead;
    # we keep the Pallas path since that is the deliverable.

    if tm is None:
        tm = _choose_tm(F, K, M, jnp.dtype(compute_dtype).itemsize)
    m_pad = pl.cdiv(M, tm) * tm
    num_m = m_pad // tm

    # Hoisted, grid-invariant feature column norms (only needed if normalize).
    feat_n2 = jnp.sum(jnp.square(feature.astype(jnp.float32)), axis=0,
                      keepdims=True)                                # (1, M)

    pad = m_pad - M
    if pad:
        alphas = jnp.pad(alphas, ((0, 0), (0, 0), (0, pad)))
        feature = jnp.pad(feature, ((0, 0), (0, pad)))
        feat_n2 = jnp.pad(feat_n2, ((0, 0), (0, pad)))

    dicts_c = dicts.astype(compute_dtype)
    alphas_c = alphas.astype(compute_dtype)
    feature_c = feature.astype(compute_dtype)

    use_gram = K <= F
    kernel = functools.partial(
        _sim_kernel, normalize=bool(normalize), inv_tau=float(1.0 / tau),
        eps=float(eps), use_gram=use_gram)

    # Grid: (m outer, dict inner) so the feature tile is not re-fetched per dict.
    in_specs = [
        pl.BlockSpec((1, F, K), lambda m, i: (i, 0, 0)),    # dict i   (small)
        pl.BlockSpec((1, K, tm), lambda m, i: (i, 0, m)),   # alpha i, tile m
        pl.BlockSpec((F, tm), lambda m, i: (0, m)),         # shared feature tile
    ]
    args = [dicts_c, alphas_c, feature_c]
    if normalize:
        in_specs.append(pl.BlockSpec((1, tm), lambda m, i: (0, m)))  # ||feat||^2
        args.append(feat_n2)

    out = pl.pallas_call(
        kernel,
        out_shape=jax.ShapeDtypeStruct((N, 1, m_pad), jnp.float32),
        grid_spec=pltpu.PrefetchScalarGridSpec(
            num_scalar_prefetch=0,
            grid=(num_m, N),
            in_specs=in_specs,
            # Per-(dict, tile) lane-dense output blocks -> unmasked full stores.
            out_specs=pl.BlockSpec((1, 1, tm), lambda m, i: (i, 0, m)),
        ),
        compiler_params=pltpu.CompilerParams(
            dimension_semantics=("parallel", "parallel"),
            vmem_limit_bytes=48 * 1024 * 1024),
    )(*args)

    return out.reshape(N, m_pad)[:, :M]


def feature_contrastive_sr_loss(dicts, alphas, feature, positive_indices,
                                normalize=False, tau=1.0, eps=1e-8,
                                compute_dtype=jnp.bfloat16, tm=None):
    """Forward pass of FeatureContrastiveSRLoss (the module's intended body)."""
    dict_sim = compute_dict_sim(
        dicts, alphas, feature, normalize=normalize, tau=tau, eps=eps,
        compute_dtype=compute_dtype, tm=tm)

    n_dict = dicts.shape[0]
    max_p = max((len(p) for p in positive_indices), default=0)
    if max_p == 0:
        return jnp.float32(0.0), dict_sim

    # Vectorized positive-index handling: one padded gather + masked sums.
    idx = np.zeros((n_dict, max_p), dtype=np.int32)
    msk = np.zeros((n_dict, max_p), dtype=np.float32)
    for i, p in enumerate(positive_indices):
        if len(p):
            idx[i, :len(p)] = np.asarray(p, dtype=np.int32)
            msk[i, :len(p)] = 1.0
    idx = jnp.asarray(idx)
    msk = jnp.asarray(msk)
    has_pos = jnp.asarray([len(p) > 0 for p in positive_indices])

    gathered = dict_sim[:, idx]                             # (N_j, N_i, P)
    masked = gathered * msk[None, :, :]
    sim_all_sum = jnp.sum(masked, axis=(0, 2))              # (N_i,)
    diag = gathered[jnp.arange(n_dict), jnp.arange(n_dict), :]   # (N_i, P)
    sim_pos_sum = jnp.sum(diag * msk, axis=1)               # (N_i,)

    sim_pos_safe = jnp.where(has_pos, sim_pos_sum, 1.0)
    sim_all_safe = jnp.where(has_pos, jnp.maximum(sim_all_sum, eps), 1.0)
    per_dict = -jnp.log(sim_pos_safe / sim_all_safe)        # .mean() on scalar: no-op
    total_loss = jnp.sum(jnp.where(has_pos, per_dict, 0.0))
    return total_loss, dict_sim


def _reference_loss(dicts, alphas, feature, positive_indices,
                    normalize=False, tau=1.0, eps=1e-8):
    """Pure-JAX reference for correctness checking."""
    sims = []
    for i in range(dicts.shape[0]):
        f_r = dicts[i] @ alphas[i]
        sim = jnp.sum(f_r * feature, axis=0)
        if normalize:
            norm = jnp.maximum(
                jnp.linalg.norm(f_r, axis=0) * jnp.linalg.norm(feature, axis=0),
                eps)
            sim = sim / norm
        sims.append(jnp.exp(sim / tau))
    dict_sim = jnp.stack(sims, axis=0)
    total = jnp.float32(0.0)
    for i in range(dicts.shape[0]):
        pos = positive_indices[i]
        if len(pos) == 0:
            continue
        pos = jnp.asarray(pos, dtype=jnp.int32)
        sim_all = jnp.sum(dict_sim[:, pos])
        sim_pos = jnp.sum(dict_sim[i, pos])
        total = total + (-jnp.log(sim_pos / jnp.maximum(sim_all, eps)))
    return total, dict_sim


if __name__ == "__main__":
    # Small shapes consistent with the module's conventions.
    N_DICT, F, K, M = 2, 32, 16, 200   # dicts, feature dim, dict size, data number
    key = jax.random.PRNGKey(0)
    k1, k2, k3 = jax.random.split(key, 3)

    dicts = jax.random.normal(k1, (N_DICT, F, K), dtype=jnp.float32) * 0.2
    alphas = jax.random.normal(k2, (N_DICT, K, M), dtype=jnp.float32) * 0.2
    feature = jax.random.normal(k3, (F, M), dtype=jnp.float32) * 0.2
    positive_indices = [[0, 2, 5, 17], [1, 3, 150]]

    ref_loss, ref_sim = _reference_loss(
        dicts, alphas, feature, positive_indices,
        normalize=False, tau=1.0, eps=1e-8)
    ref_loss_n, ref_sim_n = _reference_loss(
        dicts, alphas, feature, positive_indices,
        normalize=True, tau=1.0, eps=1e-8)

    # 1) f32 MXU path with a small explicit tile (exercises M tiling + padding).
    loss, dict_sim = feature_contrastive_sr_loss(
        dicts, alphas, feature, positive_indices,
        normalize=False, tau=1.0, eps=1e-8,
        compute_dtype=jnp.float32, tm=128)
    loss = jax.block_until_ready(loss)
    assert jnp.allclose(dict_sim, ref_sim, rtol=1e-4, atol=1e-5), "dict_sim mismatch"
    assert jnp.allclose(loss, ref_loss, rtol=1e-4, atol=1e-5), "loss mismatch"

    # 2) normalize=True path (hoisted feature norm + Gram-form reconstruction norm).
    loss_n, sim_n = feature_contrastive_sr_loss(
        dicts, alphas, feature, positive_indices,
        normalize=True, tau=1.0, eps=1e-8,
        compute_dtype=jnp.float32, tm=128)
    loss_n = jax.block_until_ready(loss_n)
    assert jnp.allclose(sim_n, ref_sim_n, rtol=1e-4, atol=1e-5), "norm sim mismatch"
    assert jnp.allclose(loss_n, ref_loss_n, rtol=1e-4, atol=1e-5), "norm loss mismatch"

    # 3) Default fast path: bf16 MXU inputs, auto tile size.
    loss_b, sim_b = feature_contrastive_sr_loss(
        dicts, alphas, feature, positive_indices,
        normalize=False, tau=1.0, eps=1e-8)
    loss_b = jax.block_until_ready(loss_b)
    assert jnp.allclose(sim_b, ref_sim, rtol=5e-2, atol=5e-2), "bf16 sim mismatch"
    assert jnp.allclose(loss_b, ref_loss, rtol=5e-2, atol=5e-2), "bf16 loss mismatch"

    print("KERNEL_OK")
</pallas_src>

<mosaic_0001>
module attributes {stable_mosaic.version = 11 : i64} {
  func.func @_sim_kernel(%arg0: i32, %arg1: i32, %arg2: memref<1x32x16xf32, #tpu.memory_space<vmem>>, %arg3: memref<1x16x128xf32, #tpu.memory_space<vmem>>, %arg4: memref<32x128xf32, #tpu.memory_space<vmem>>, %arg5: memref<1x1x128xf32, #tpu.memory_space<vmem>>) attributes {dimension_semantics = [#tpu.dimension_semantics<parallel>, #tpu.dimension_semantics<parallel>], iteration_bounds = array<i64: 2, 2>, scalar_prefetch = 0 : i64, scratch_operands = 0 : i64, tpu.core_type = #tpu.core_type<tc>, window_params = [{transform_indices = @transform_0, window_bounds = array<i64: 1, 32, 16>}, {transform_indices = @transform_1, window_bounds = array<i64: 1, 16, 128>}, {transform_indices = @transform_2, window_bounds = array<i64: 32, 128>}, {transform_indices = @transform_3, window_bounds = array<i64: 1, 1, 128>}]} {
    %c0 = arith.constant 0 : index
    %c0_0 = arith.constant 0 : index
    %c0_1 = arith.constant 0 : index
    %0 = vector.load %arg2[%c0, %c0_0, %c0_1] : memref<1x32x16xf32, #tpu.memory_space<vmem>>, vector<1x32x16xf32>
    %1 = vector.shape_cast %0 : vector<1x32x16xf32> to vector<32x16xf32>
    %c0_2 = arith.constant 0 : index
    %c0_3 = arith.constant 0 : index
    %c0_4 = arith.constant 0 : index
    %2 = vector.load %arg3[%c0_2, %c0_3, %c0_4] : memref<1x16x128xf32, #tpu.memory_space<vmem>>, vector<1x16x128xf32>
    %3 = vector.shape_cast %2 : vector<1x16x128xf32> to vector<16x128xf32>
    %c0_5 = arith.constant 0 : index
    %c0_6 = arith.constant 0 : index
    %4 = vector.load %arg4[%c0_5, %c0_6] : memref<32x128xf32, #tpu.memory_space<vmem>>, vector<32x128xf32>
    %cst = arith.constant dense<0.000000e+00> : vector<16x128xf32>
    %5 = tpu.matmul %1, %4, %cst {dimension_numbers = #tpu.dot_dimension_numbers<[0], [0], [1], [1], [0, 1, 1, 1], [], []>} : vector<32x16xf32>, vector<32x128xf32>, vector<16x128xf32> -> vector<16x128xf32>
    %6 = arith.mulf %3, %5 : vector<16x128xf32>
    %cst_7 = arith.constant dense<0.000000e+00> : vector<128xf32>
    %7 = vector.multi_reduction <add>, %6, %cst_7 [0] : vector<16x128xf32> to vector<128xf32>
    %8 = vector.shape_cast %7 : vector<128xf32> to vector<1x128xf32>
    %cst_8 = arith.constant 1.000000e+00 : f32
    %9 = vector.broadcast %cst_8 : f32 to vector<1x128xf32>
    %10 = arith.mulf %8, %9 : vector<1x128xf32>
    %11 = math.exp %10 : vector<1x128xf32>
    %12 = vector.shape_cast %11 : vector<1x128xf32> to vector<1x1x128xf32>
    %c0_9 = arith.constant 0 : index
    %c0_10 = arith.constant 0 : index
    %c0_11 = arith.constant 0 : index
    %13 = vector.load %arg5[%c0_9, %c0_10, %c0_11] : memref<1x1x128xf32, #tpu.memory_space<vmem>>, vector<1x1x128xf32>
    tpu.vector_store %arg5[%c0_9, %c0_10, %c0_11], %12 {strides = array<i32>} : memref<1x1x128xf32, #tpu.memory_space<vmem>>, vector<1x1x128xf32>,
    return
  }
  func.func @transform_0(%arg0: i32, %arg1: i32) -> (i32, i32, i32) {
    %c0_i32 = arith.constant 0 : i32
    %c0_i32_0 = arith.constant 0 : i32
    %c0_i32_1 = arith.constant 0 : i32
    return %arg1, %c0_i32, %c0_i32_0 : i32, i32, i32
  }
  func.func @transform_1(%arg0: i32, %arg1: i32) -> (i32, i32, i32) {
    %c0_i32 = arith.constant 0 : i32
    %c0_i32_0 = arith.constant 0 : i32
    return %arg1, %c0_i32, %arg0 : i32, i32, i32
  }
  func.func @transform_2(%arg0: i32, %arg1: i32) -> (i32, i32) {
    %c0_i32 = arith.constant 0 : i32
    %c0_i32_0 = arith.constant 0 : i32
    return %c0_i32, %arg0 : i32, i32
  }
  func.func @transform_3(%arg0: i32, %arg1: i32) -> (i32, i32, i32) {
    %c0_i32 = arith.constant 0 : i32
    %c0_i32_0 = arith.constant 0 : i32
    return %arg1, %c0_i32, %arg0 : i32, i32, i32
  }
}

</mosaic_0001>

<bundles_post_ra>
// kernel: tpu_custom_call.1
= control target key start
LH: loop header
LB: loop body
LE: loop exit
PB: predicated region body
PF: predicated region fallthrough
CT: control target
= control target key end

     0   :  { %8 = vsyncpa [#allocation4], 0  ;;  %s1071_s0 = inlined_call_operand.vmem [shape: f32[2,32,16], index: 0, kind: input, shape index: {}]   ;;  %s1072_s1 = inlined_call_operand.vmem [shape: f32[2,16,256], index: 1, kind: input, shape index: {}]   ;;  %s1073_s2 = inlined_call_operand.hbm [shape: f32[32,256], index: 2, kind: input, shape index: {}]   ;;  %s1074_s3 = inlined_call_operand.hbm [shape: f32[2,1,256], index: 3, kind: output, shape index: {}]  }
   0x1   :  { %10 = vsyncpa [#allocation4 + $0x1], 0 }
   0x2   :  { %11 = vsyncpa [#allocation5], 0 }
   0x3   :  { %13 = vsyncpa [#allocation5 + $0x1], 0  ;;  %s860_s12 = smov 0   ;;  %s862_s13 = smov 0  }
   0x4   :  { %s864_s14 = smov 0   ;;  %s866_s15 = smov 0  }
   0x5   :  { %s868_s16 = smov 0   ;;  %s870_s17 = smov 0  }
   0x6   :  { %s872_s18 = smov 0   ;;  %s874_s19 = smov 0  }
   0x7   :  { %s876_s20 = smov 0   ;;  %s878_s21 = smov 0  }
   0x8   :  { %s880_s22 = smov 0  }
   0x9 LB: > { %1079 = sst [smem:[#allocation9_spill]] %s813_s17  ;;  %s546_s23 = sadd.s32 4294967295, %s833_s22   ;;  %s833_s22 = sphi %s880_s22, %s19_s22   ;;  %s829_s21 = sphi %s878_s21, %s1100_s21   ;;  %s825_s20 = sphi %s876_s20, %s1092_s20   ;;  %s821_s19 = sphi %s874_s19, %s1099_s19   ;;  %s817_s18 = sphi %s872_s18, %s1091_s18   ;;  %s813_s17 = sphi %s870_s17, %s1090_s17   ;;  %s809_s16 = sphi %s868_s16, %s1098_s16   ;;  %s805_s15 = sphi %s866_s15, %s1097_s15   ;;  %s801_s14 = sphi %s864_s14, %s1096_s14   ;;  %s797_s13 = sphi %s862_s13, %s1095_s13   ;;  %s793_s12 = sphi %s860_s12, %s1094_s12  }
   0xa   : > { %1080 = sst [smem:[#allocation10_spill]] %s825_s20  ;;  %s547_s24 = sadd.s32 4294967294, %s833_s22  }
   0xb   : > { %s28_s25 = sadd.s32 1, %s825_s20  ;;  %s31_s26 = sadd.s32 1, %s829_s21 }
   0xc   : > { %p29_p0 = scmp.ge.s32.totalorder %s28_s25, 2  ;;  %s66_s27 = sadd.s32 1, %s813_s17 }
   0xd   : > { %p73_p1 = scmp.ne.s32.totalorder %s813_s17, %s809_s16  ;;  %p74_p2 = scmp.eq.s32.totalorder %s833_s22, 0 }
   0xe   : > { %s1102_s25 = smov (%p29_p0, %s28_s25), 0  ;;  %s1104_s26 = smov (!%p29_p0, %s31_s26), %s829_s21 }
   0xf   : > { %1081 = sst [smem:[#allocation11_spill]] %s1102_s25  ;;  %s61_s28 = ssub.s32 %s825_s20, %s1102_s25 }
  0x10   : > { %p931_p3 = por %p74_p2, %p73_p1  ;;  %p33_p4 = scmp.ge.s32.totalorder %s1104_s26, 2 }
  0x11   : > { %s92_s30 = sadd.s32 1, %s805_s15  ;;  %p99_p5 = scmp.ne.s32.totalorder %s805_s15, %s801_s14 }
  0x12   : > { %p105_p6 = scmp.ne.s32.totalorder %s801_s14, %s797_s13  ;;  %s1106_s26 = smov (%p33_p4, %s1104_s26), 0 }
  0x13   : > { %1083 = sst [smem:[#allocation12_spill]] %s1106_s26  ;;  %p942_p7 = por %p99_p5, %p74_p2 }
  0x14   : > { %p106_p8 = scmp.eq.s32.totalorder %s546_s23, 0  ;;  %s62_s5 = ssub.s32 %s829_s21, %s1106_s26 }
  0x15   : > { %p131_p9 = scmp.eq.s32.totalorder %s546_s23, 3  ;;  %s63_s6 = sor.u32 %s62_s5, %s61_s28 }
  0x16   : > { %p90_p10 = scmp.eq.s32.totalorder %s62_s5, 0  ;;  %p64_p11 = scmp.eq.s32.totalorder %s63_s6, 0 }
  0x17   : > { %p948_p12 = por %p106_p8, %p105_p6  ;;  %p961_p13 = por %p131_p9, %p73_p1 }
  0x18   : > { %s953_s8 = scalar_select %p90_p10, %s805_s15, %s92_s30  }
  0x19   : > { %s956_s9 = scalar_select %p64_p11, %s813_s17, %s66_s27  }
  0x1a   : > { %p136_p0 = scmp.ne.s32.totalorder %s809_s16, %s793_s12  ;;  %p137_p2 = scmp.eq.s32.totalorder %s547_s24, 3 }
  0x1b   : > { %1086 = sst [smem:[#allocation13_spill]] %s956_s9  ;;  %p549_p5 = scmp.ge.s32.totalorder %s833_s22, 4 }
  0x1c   : > { %p967_p4 = por %p137_p2, %p136_p0 }
  0x1d   : > { %153 = sbr.rel (%p549_p5) target bundleno = 58 (0x3a), region = 16 }
  0x22   : > { %164 = sbr.rel (!%p931_p3) target bundleno = 41 (0x29), region = 24  ;;  %s166_s13 = sand.u32 (%p931_p3), 1, %s813_s17  }
  0x23   : > { %s551_s23 = sshll.u32 (%p931_p3), %s825_s20, 2  ;;  %s550_s27 = sshll.u32 (%p931_p3), %s166_s13, 4 }
  0x24   : > { %s170_s28 = sadd.s32 (%p931_p3), %s829_s21, %s551_s23  ;;  %s168_s26 = scalar_lea.vmem (%p931_p3), [#allocation2], %s550_s27 }
  0x25   : > { %s552_s30 = sshll.u32 (%p931_p3), %s170_s28, 3 }
  0x26   : > { %s172_s6 = scalar_lea.vmem (%p931_p3), %s1072_s1, %s552_s30 }
  0x27   : > { %v203_v0 = vld [vmem:[%s172_s6] sm:$0xff]  ;;  %v205_v1 = vld [vmem:[%s172_s6 + $0x10] sm:$0xff] }
  0x28   : > { %204 = vst [vmem:[%s168_s26] sm:$0xff] %v203_v0  ;;  %206 = vst [vmem:[%s168_s26 + $0x8] sm:$0xff] %v205_v1 }
  0x29 PF: > { %s213_s29 = sand.u32 1, %s805_s15   ;;  %s554_s25 = sshll.u32 %s829_s21, 7 }
  0x2a   : > { %s553_s9 = sshll.u32 %s213_s29, 5  ;;  %s222_s23 = scalar_lea.hbm %s1073_s2, %s554_s25 }
  0x2b   : > { %s217_s28 = scalar_lea.vmem [#allocation3], %s553_s9  ;;  %s214_s30 = scalar_lea.sflag [#allocation4], %s213_s29 }
  0x2c   : > { %s223_s17 = sshll.u32 %s217_s28, 4  ;;  %s835_s26 = smov [#allocation3]   ;;  %s224_s17 = int_to_ptr.vmem [resolvable:$true] %s223_s17 }
  0x2d   : > { %s699_s5 = scalar_lea.vmem %s224_s17, 512  ;;  %s703_s27 = sshll.u32 %s835_s26, 4  ;;  %s704_s27 = int_to_ptr.vmem [resolvable:$false] %s703_s27 }
  0x2e   : > { %p700_p1 = scmp.ne.s32.totalorder %s224_s17, %s699_s5  ;;  %s705_s24 = scalar_lea.vmem %s704_s27, 1024 }
  0x2f   : > { %p706_p8 = scmp.lt.s32.totalorder %s224_s17, %s704_s27  ;;  %p707_p9 = scmp.lt.s32.totalorder %s705_s24, %s699_s5 }
  0x30   : > { %p701_p3 = pnand %p700_p1, %p942_p7 }
  0x31   : > { %p708_p10 = por %p707_p9, %p706_p8 }
  0x32   : > { %p702_p6 = pneg %p701_p3 }
  0x34   : > { %p709_p11 = pnand %p708_p10, %p702_p6 }
  0x36   : > { %712 = shalt.err (!%p709_p11)
}
  0x37   : > { %s836_s20 = smov 256   ;;  %s837_s25 = smov 128  }
  0x38   : > { %s838_s9 = smov 8  }
  0x39   : > { %584 = dma.hbm_to_vmem [thread:$0]  (%p942_p7), %s222_s23, 512, %s224_s17, %s214_s30, %s836_s20, %s837_s25, %s838_s9  }
  0x3a PF: > { %p555_p0 = scmp.ge.s32.totalorder %s833_s22, 1  ;;  %p231_p2 = scmp.lt.s32.totalorder %s833_s22, 5 }
  0x3c   : > { %p232_p5 = pnand %p555_p0, %p231_p2 }
  0x3d   : > { %s992_s6 = sand.u32 (!%p232_p5), 1, %s809_s16   ;;  %s244_s29 = sand.u32 (!%p232_p5), 1, %s801_s14  }
  0x3e   : > { %235 = sbr.rel (%p232_p5) target bundleno = 444 (0x1bc), region = 66  ;;  %s556_s13 = sshll.u32 (!%p232_p5), %s992_s6, 4 }
  0x3f   : > { %s557_s28 = sshll.u32 (!%p232_p5), %s244_s29, 5  ;;  %s996_s5 = scalar_lea.vmem (!%p232_p5), [#allocation2], %s556_s13 }
  0x40   : > { %s245_s4 = scalar_lea.sflag (!%p232_p5), [#allocation4], %s244_s29  ;;  %s248_s17 = scalar_lea.vmem (!%p232_p5), [#allocation3], %s557_s28 }
  0x43   : > { %784 = dma.done.wait (%p948_p12), %s245_s4, 512  }
  0x44   : > { %786 = vsyncadd (%p948_p12), %s245_s4, 4294966784  ;;  %p279_p7 = scmp.lt.s32.totalorder %s817_s18, 1  ;;  %v293_v3 = vld [vmem:[%s248_s17 + $0x18] sm:$0xff]  ;;  %v292_v4 = vld [vmem:[%s248_s17 + $0x10] sm:$0xff]  ;;  %vm326_vm0 = vcmask 261120   ;;  %s562_s7 = sshll.u32 %s817_s18, 1 }
  0x45   : > { %573 = vmatprep.subr.mxu0 %v293_v3  ;;  %v291_v6 = vld [vmem:[%s248_s17 + $0x8] sm:$0xff]  ;;  %v290_v7 = vld [vmem:[%s248_s17] sm:$0xff]  ;;  %s431_s20 = sadd.s32 %s821_s19, %s562_s7  ;;  %s278_s9 = scalar_lea.vmem [#allocation6], %s992_s6 }
  0x46   : > { %s280_s23 = scalar_select %p279_p7, %s817_s18, 1  ;;  %574 = vmatpush3.msra.mxu0 %v293_v3  ;;  %v289_v12 = vld [vmem:[%s996_s5 + $0x8] sm:$0xff]  ;;  %v288_v14 = vld [vmem:[%s996_s5] sm:$0xff] }
  0x47   : > { %575 = vmatprep.subr.mxu0 %v292_v4  ;;  %s563_s25 = sshll.u32 %s431_s20, 4  ;;  %s435_s29 = sshll.u32 %s278_s9, 4  ;;  %s436_s29 = int_to_ptr.vmem [resolvable:$true] %s435_s29 }
  0x48   : > { %s566_s30 = sshll.u32 %s280_s23, 5  ;;  %576 = vmatpush3.msra.mxu0 %v292_v4  ;;  %s1015_s5 = scalar_lea.hbm %s1074_s3, %s563_s25 }
  0x49   : > { %s283_s24 = scalar_lea.vmem %s1071_s0, %s566_s30  ;;  %577 = vmatprep.subr.mxu0 %v291_v6  ;;  %s421_s4 = scalar_lea.sflag [#allocation5], %s992_s6 }
  0x4a   : > { %v284_v2 = vld [vmem:[%s283_s24] sm:$0xff]  ;;  %v285_v5 = vld [vmem:[%s283_s24 + $0x8] sm:$0xff]  ;;  %v286_v8 = vld [vmem:[%s283_s24 + $0x10] sm:$0xff]  ;;  %578 = vmatpush3.msra.mxu0 %v291_v6  ;;  %s713_s17 = scalar_lea.vmem %s436_s29, 16  ;;  %s839_s23 = smov [#allocation6]  }
  0x4b   : > { %294 = vxpose.xlu0.b32.start [1/4] (short) (narrow) %v284_v2, 16  ;;  %579 = vmatprep.subr.mxu0 %v290_v7  ;;  %v287_v9 = vld [vmem:[%s283_s24 + $0x18] sm:$0xff]  ;;  %p714_p12 = scmp.ne.s32.totalorder %s436_s29, %s713_s17  ;;  %s717_s18 = sshll.u32 %s839_s23, 4  ;;  %s718_s18 = int_to_ptr.vmem [resolvable:$false] %s717_s18 }
  0x4c   : > { %580 = vmatpush3.msra.mxu0 %v290_v7  ;;  %s719_s19 = scalar_lea.vmem %s718_s18, 32  ;;  %p720_p6 = scmp.lt.s32.totalorder %s436_s29, %s718_s18 }
  0x4d   : > { %p715_p1 = pnand %p714_p12, %p961_p13  ;;  %p721_p8 = scmp.lt.s32.totalorder %s719_s19, %s713_s17 }
  0x4f   : > { %295 = vxpose.xlu0.b32.cont [2/4] (short) (narrow) %v285_v5, 16  ;;  %p716_p3 = pneg %p715_p1  ;;  %p722_p9 = por %p721_p8, %p720_p6 }
  0x51   : > { %p723_p10 = pnand %p722_p9, %p716_p3 }
  0x53   : > { %296 = vxpose.xlu0.b32.cont [3/4] (short) (narrow) %v286_v8, 16 }
  0x57   : > { %297 = vxpose.xlu0.b32.end [4/4] (short) (narrow) %v287_v9, 16 }
  0xc7   : > { %v310_v10 = vpop.trf.xlu0 }
  0xc8   : > { %581 = vmatprep.mubr.msk.f32.mxu0 %vm326_vm0, %v310_v10 }
  0xcb   : > { %v311_v11 = vpop.trf.xlu0 }
  0xcc   : > { %582 = vmatmul.mubr.msk.f32.vlgmr.msra.gmra.mxu0 %vm326_vm0, %v311_v11 }
 0x18c   : > { %v583_v13 = vpop.f32.mrf.mxu0 }
 0x18d   : > { %v409_v16 = vmul.f32 %v583_v13, %v289_v12 }
 0x18e   : > { %v399_v15 = vpop.f32.mrf.mxu0 }
 0x18f   : > { %v408_v17 = vmul.f32 %v399_v15, %v288_v14 }
 0x191   : > { %v410_v18 = vadd.f32 %v409_v16, %v408_v17 }
 0x193   : > { %v411_v19 = vrot.slane %v410_v18, 4 }
 0x195   : > { %v412_v20 = vadd.f32 %v411_v19, %v410_v18 }
 0x197   : > { %v413_v21 = vrot.slane %v412_v20, 2 }
 0x199   : > { %v414_v22 = vadd.f32 %v413_v21, %v412_v20 }
 0x19b   : > { %v415_v23 = vrot.slane %v414_v22, 1 }
 0x19d   : > { %v416_v24 = vadd.f32 %v415_v23, %v414_v22 }
 0x19f   : > { %v417_v25 = vmul.f32 1.442695, %v416_v24 }
 0x1a1   : > { %685 = vpow2.f32 %v417_v25 }
 0x1ae   : > { %v686_v26 = vpop.eup %685 }
 0x1af   : > { %419 = vst [vmem:[%s278_s9] sm:$0x1] %v686_v26 }
 0x1b0   : > { %726 = shalt.err (!%p723_p10)
}
 0x1b1   : > { %s727_s30 = scalar_lea.hbm %s1015_s5, 16  ;;  %s731_s27 = scalar_lea.hbm %s1074_s3, 64 }
 0x1b2   : > { %p728_p11 = scmp.ne.s32.totalorder %s1015_s5, %s727_s30  ;;  %p732_p5 = scmp.lt.s32.totalorder %s1015_s5, %s1074_s3 }
 0x1b3   : > { %p733_p7 = scmp.lt.s32.totalorder %s731_s27, %s727_s30 }
 0x1b4   : > { %p729_p0 = pnand %p728_p11, %p961_p13 }
 0x1b5   : > { %p734_p12 = por %p733_p7, %p732_p5 }
 0x1b6   : > { %p730_p2 = pneg %p729_p0 }
 0x1b8   : > { %p735_p1 = pnand %p734_p12, %p730_p2 }
 0x1ba   : > { %738 = shalt.err (!%p735_p1)
}
 0x1bb   : > { %586 = dma.vmem_to_hbm [thread:$0]  (%p961_p13), %s436_s29, 16, %s1015_s5, %s421_s4  }
 0x1bc PF: > { %p592_p3 = scmp.ge.s32.totalorder %s833_s22, 2  ;;  %s447_s20 = sand.u32 1, %s793_s12  }
 0x1bd   : > { %s448_s25 = scalar_lea.sflag [#allocation5], %s447_s20 }
 0x1be   : > { %p589_p6 = pnand %p592_p3, %p967_p4 }
 0x1c0   : > { %p590_p8 = pneg %p589_p6 }
 0x1c2   : > { %788 = dma.done.wait (%p590_p8), %s448_s25, 16  }
 0x1c3   : > { %790 = vsyncadd (%p590_p8), %s448_s25, 4294967280  ;;  %s19_s22 = sadd.s32 1, %s833_s22   ;;  %s1089_s10 = sld [smem:[#allocation9_spill]] }
 0x1c4   : > { %p16_p9 = scmp.ge.s32.totalorder %s19_s22, 6   ;;  %s1090_s17 = sld [smem:[#allocation13_spill]] }
 0x1c5   : > { %s1091_s18 = sld [smem:[#allocation10_spill]]  ;;  %s1094_s12 = smov %s809_s16 }
 0x1c6   : > { %s1092_s20 = sld [smem:[#allocation11_spill]]  ;;  %s1095_s13 = smov %s801_s14 }
 0x1c7   : > { %s1093_s9 = sld [smem:[#allocation12_spill]]  ;;  %s1096_s14 = smov %s805_s15 }
 0x1c8   : > { %s1097_s15 = smov %s953_s8  ;;  %s1099_s19 = smov %s829_s21 }
 0x1c9   : > { %s1098_s16 = smov %s1089_s10  ;;  %18 = sbr.rel (!%p16_p9) target bundleno = 9 (0x9), region = 126 }
 0x1cd   : > { %s1100_s21 = smov %s1093_s9 }
 0x1ce   :  { %452 = vsyncpa [#allocation4], 1 }
 0x1cf   :  { %454 = vsyncpa [#allocation4 + $0x1], 1 }
 0x1d0   :  { %455 = vsyncpa [#allocation5], 1 }
 0x1d1   :  { %457 = vsyncpa [#allocation5 + $0x1], 1 }

</bundles_post_ra>
